<compile_context>
chip_gen: v7x
topology: tpu7x:2x2x1
jax: 0.10.0
libtpu: 0.0.40
codegen_flags: <defaults>
</compile_context>

<pallas_src>
import functools
import math

import numpy as np
import jax
import jax.numpy as jnp
from jax.experimental import pallas as pl
from jax.experimental.pallas import tpu as pltpu

_LANES = 128


def _round_up(x, m):
    return (x + m - 1) // m * m


def _cdiv(a, b):
    return (a + b - 1) // b


def _pick_m_tiling(M, tile_m):
    """Row tiling for the matmul path: 16-aligned (bf16-safe), >=2 grid steps
    when there is enough work (v7x megacore), minimal dead padded rows."""
    m16 = _round_up(M, 16)
    tile_m = max(16, min(tile_m, m16))
    if m16 // tile_m < 2 and m16 >= 32:
        tile_m = _round_up(_cdiv(m16, 2), 16)
    grid_m = _cdiv(m16, tile_m)
    tile_m = _round_up(_cdiv(m16, grid_m), 16)    # shrink tile -> avoid waste
    m_pad = grid_m * tile_m
    return tile_m, grid_m, m_pad


# ---------------------------------------------------------------------------
# Tiled matmul + bias + optional ReLU  (conv / fused-head hot path, MXU)
# ---------------------------------------------------------------------------
def _matmul_bias_act_kernel(a_ref, w_ref, b_ref, o_ref, *, relu):
    acc = jnp.dot(a_ref[...], w_ref[...], preferred_element_type=jnp.float32)
    acc = acc + b_ref[...]                 # bias + ReLU epilogue stays in f32
    if relu:
        acc = jnp.maximum(acc, 0.0)
    o_ref[...] = acc.astype(o_ref.dtype)


def matmul_bias_act(a, w, b, relu, *, out_dtype=jnp.float32,
                    compute_dtype=jnp.bfloat16, tile_m=1024):
    """[M,K] @ [K,Cout] + b (+ReLU).

    A is tiled over M (double-buffered), W/bias stay resident.  Cout is padded
    to a multiple of 128 (lane-dense unmasked stores); a small K is padded to a
    full lane width so loads / MXU pushes are dense.  Returns the padded
    result [M_pad, Cout_pad] in `out_dtype`; callers slice.
    """
    M, K = a.shape
    K2, cout = w.shape
    assert K == K2
    cout_pad = _round_up(cout, _LANES)
    k_pad = _LANES if K < _LANES else K
    tile_m, grid_m, m_pad = _pick_m_tiling(M, tile_m)

    a_p = jnp.pad(a.astype(compute_dtype), ((0, m_pad - M), (0, k_pad - K)))
    w_p = jnp.pad(w.astype(compute_dtype), ((0, k_pad - K), (0, cout_pad - cout)))
    b_p = jnp.pad(b.astype(jnp.float32), (0, cout_pad - cout)).reshape(1, cout_pad)

    in_isz = np.dtype(compute_dtype).itemsize
    out_isz = np.dtype(out_dtype).itemsize
    # Double-buffered A / out tiles + resident W / bias, with headroom.
    tile_bytes = (2 * tile_m * k_pad * in_isz
                  + 2 * k_pad * cout_pad * in_isz
                  + 2 * cout_pad * 4
                  + 2 * tile_m * cout_pad * out_isz)
    vmem_limit = int(min(max(2 * tile_bytes, 32 * 1024 * 1024), 64 * 1024 * 1024))

    cost = pl.CostEstimate(
        flops=2 * m_pad * k_pad * cout_pad,
        transcendentals=0,
        bytes_accessed=int(a_p.size * in_isz + w_p.size * in_isz
                           + b_p.size * 4 + m_pad * cout_pad * out_isz))

    out = pl.pallas_call(
        functools.partial(_matmul_bias_act_kernel, relu=relu),
        out_shape=jax.ShapeDtypeStruct((m_pad, cout_pad), out_dtype),
        grid=(grid_m,),
        in_specs=[
            pl.BlockSpec((tile_m, k_pad), lambda i: (i, 0)),     # A tile (pipelined)
            pl.BlockSpec((k_pad, cout_pad), lambda i: (0, 0)),   # W resident
            pl.BlockSpec((1, cout_pad), lambda i: (0, 0)),       # bias resident
        ],
        out_specs=pl.BlockSpec((tile_m, cout_pad), lambda i: (i, 0)),
        compiler_params=pltpu.CompilerParams(
            dimension_semantics=("parallel",),
            vmem_limit_bytes=vmem_limit),
        cost_estimate=cost,
    )(a_p, w_p, b_p)
    return out


# ---------------------------------------------------------------------------
# Conv2d, channels-last (NHWC): bf16 tap gather + Pallas MXU matmul
# ---------------------------------------------------------------------------
def conv2d_nhwc(x, w_oihw, b, stride, pad, relu, *, out_dtype=jnp.bfloat16,
                compute_dtype=jnp.bfloat16):
    N, H, W, cin = x.shape
    cout, cin_w, kh, kw = w_oihw.shape
    assert cin_w == cin
    hout = (H + 2 * pad - kh) // stride + 1
    wout = (W + 2 * pad - kw) // stride + 1
    # Cast to the MXU compute dtype BEFORE the tap gather so the im2col matrix
    # is materialized (and re-read) at half the HBM bytes.
    xp = jnp.pad(x.astype(compute_dtype),
                 ((0, 0), (pad, pad), (pad, pad), (0, 0)))
    # TODO(synk): fold this tap gather into the matmul kernel (tap grid axis
    # marked "arbitrary" + f32 VMEM accumulator indexing the padded NHWC input
    # directly) to remove the kh*kw im2col blow-up in HBM entirely.
    taps = []
    for i in range(kh):
        for j in range(kw):
            taps.append(xp[:, i:i + stride * hout:stride,
                            j:j + stride * wout:stride, :])
    a = jnp.concatenate(taps, axis=-1).reshape(N * hout * wout, cin * kh * kw)
    wmat = jnp.transpose(w_oihw, (2, 3, 1, 0)).reshape(kh * kw * cin, cout)
    out = matmul_bias_act(a, wmat, b, relu, out_dtype=out_dtype,
                          compute_dtype=compute_dtype)
    return out[:N * hout * wout, :cout].reshape(N, hout, wout, cout)


# ---------------------------------------------------------------------------
# Bilinear upsampling (align_corners=False), NCHW, out + sal fused
# ---------------------------------------------------------------------------
def _bilinear_matrix(out_size, in_size):
    scale = in_size / out_size
    i = np.arange(out_size)
    src = np.clip((i + 0.5) * scale - 0.5, 0.0, None)
    i0 = np.minimum(np.floor(src).astype(np.int64), in_size - 1)
    frac = src - i0
    i1 = np.minimum(i0 + 1, in_size - 1)
    A = np.zeros((out_size, in_size), dtype=np.float32)
    A[i, i0] += (1.0 - frac).astype(np.float32)
    A[i, i1] += frac.astype(np.float32)
    return A


def _bilinear_nchw_kernel(x_ref, ah_ref, awt_ref, o_ref):
    x = x_ref[0]                      # [tile_c, Hin, Win]   (bf16)
    ah = ah_ref[...]                  # [tile_ho, Hin]
    awt = awt_ref[...]                # [Win, Wout]
    tile_c, hin, win = x.shape
    tile_ho = ah.shape[0]
    # Height pass, batched over the (small) channel tile.  Broadcasting the
    # tiny ah matrix over tile_c is cheap (unlike the old broadcast of the big
    # aw matrix over 128 output rows).
    ah_b = jnp.broadcast_to(ah[None], (tile_c, tile_ho, hin))
    t = jax.lax.dot_general(ah_b, x, (((2,), (1,)), ((0,), (0,))),
                            preferred_element_type=jnp.float32)   # [tc, tho, Win]
    # Width pass: one dense 2-D matmul with Wout on the lane axis; tile_ho is a
    # multiple of 16, so the collapse/split reshapes are layout-preserving.
    t2 = t.astype(awt.dtype).reshape(tile_c * tile_ho, win)
    o = jnp.dot(t2, awt, preferred_element_type=jnp.float32)      # [tc*tho, Wout]
    o_ref[0] = o.reshape(tile_c, tile_ho, -1).astype(o_ref.dtype)


def bilinear_resize_nchw(x, out_h, out_w, *, tile_c=8, tile_ho=64,
                         compute_dtype=jnp.bfloat16):
    """F.interpolate(mode='bilinear', align_corners=False) on an NCHW tensor.
    Grid over (batch, channel tiles, output-row tiles); output is written
    directly in NCHW so no full-resolution transpose is needed afterwards."""
    N, C, H, W = x.shape
    tile_c = max(1, min(tile_c, C))
    c_pad = _round_up(C, tile_c)
    tile_ho = _round_up(min(tile_ho, out_h), 16)
    ho_pad = _round_up(out_h, tile_ho)

    ah = np.pad(_bilinear_matrix(out_h, H), ((0, ho_pad - out_h), (0, 0)))
    awt = np.ascontiguousarray(_bilinear_matrix(out_w, W).T)       # [W, out_w]
    ah_j = jnp.asarray(ah).astype(compute_dtype)
    awt_j = jnp.asarray(awt).astype(compute_dtype)
    xq = jnp.pad(x.astype(compute_dtype),
                 ((0, 0), (0, c_pad - C), (0, 0), (0, 0)))

    in_isz = np.dtype(compute_dtype).itemsize
    tile_bytes = (2 * tile_c * H * W * in_isz + 2 * tile_ho * H * in_isz
                  + 2 * W * out_w * in_isz + 2 * tile_c * tile_ho * out_w * 4)
    vmem_limit = int(min(max(2 * tile_bytes, 32 * 1024 * 1024), 64 * 1024 * 1024))

    cost = pl.CostEstimate(
        flops=2 * N * c_pad * ho_pad * W * (H + out_w),
        transcendentals=0,
        bytes_accessed=int(xq.size * in_isz + ah_j.size * in_isz
                           + awt_j.size * in_isz + N * c_pad * ho_pad * out_w * 4))

    # TODO(synk): for very large feature maps also tile the INPUT rows to just
    # the rows each output-row tile needs (v7x VMEM), via the H-axis index_map.
    out = pl.pallas_call(
        _bilinear_nchw_kernel,
        out_shape=jax.ShapeDtypeStruct((N, c_pad, ho_pad, out_w), jnp.float32),
        grid=(N, c_pad // tile_c, ho_pad // tile_ho),
        in_specs=[
            pl.BlockSpec((1, tile_c, H, W), lambda i, j, k: (i, j, 0, 0)),
            pl.BlockSpec((tile_ho, H), lambda i, j, k: (k, 0)),
            pl.BlockSpec((W, out_w), lambda i, j, k: (0, 0)),
        ],
        out_specs=pl.BlockSpec((1, tile_c, tile_ho, out_w),
                               lambda i, j, k: (i, j, k, 0)),
        compiler_params=pltpu.CompilerParams(
            dimension_semantics=("parallel", "parallel", "parallel"),
            vmem_limit_bytes=vmem_limit),
        cost_estimate=cost,
    )(xq, ah_j, awt_j)
    return out[:, :C, :out_h]


# ---------------------------------------------------------------------------
# ContrastiveSegmentationModel.forward
# ---------------------------------------------------------------------------
def contrastive_segmentation_forward(x, params, upsample=True,
                                     use_classification_head=True,
                                     compute_dtype=jnp.bfloat16):
    N, Cin, H, W = x.shape
    xh = jnp.transpose(x, (0, 2, 3, 1))            # NCHW -> NHWC once (small input)

    feats = conv2d_nhwc(xh, params['backbone_w'], params['backbone_b'],
                        stride=2, pad=1, relu=True,
                        out_dtype=compute_dtype, compute_dtype=compute_dtype)
    emb = conv2d_nhwc(feats, params['decoder_w'], params['decoder_b'],
                      stride=1, pad=1, relu=True,
                      out_dtype=compute_dtype, compute_dtype=compute_dtype)

    n, hf, wf, ce = emb.shape
    D = params['head_w'].shape[0]

    # Fused 1x1 heads: [Ce, D] (linear head) ++ [Ce, 1] (classification head,
    # zero bias -> matches bias=False).  One matmul, lane-dense padded output.
    w_cols = [params['head_w'].reshape(D, ce).T]
    b_cols = [params['head_b']]
    if use_classification_head:
        w_cols.append(params['cls_w'].reshape(1, ce).T)
        b_cols.append(jnp.zeros((1,), jnp.float32))
    w_heads = jnp.concatenate(w_cols, axis=1)
    b_heads = jnp.concatenate(b_cols, axis=0)
    cr = w_heads.shape[1]                          # D (+1) real channels

    head_dtype = compute_dtype if upsample else jnp.float32
    heads2d = matmul_bias_act(emb.reshape(n * hf * wf, ce), w_heads, b_heads,
                              relu=False, out_dtype=head_dtype,
                              compute_dtype=compute_dtype)
    # Keep only the real channels and go to NCHW at FEATURE resolution (cheap),
    # so the upsample never touches padded lanes and writes NCHW directly.
    heads = heads2d[:n * hf * wf, :cr].reshape(n, hf, wf, cr)
    heads_nchw = jnp.transpose(heads, (0, 3, 1, 2))

    if upsample:
        up = bilinear_resize_nchw(heads_nchw, H, W,
                                  compute_dtype=compute_dtype)   # [n, cr, H, W] f32
        out = up[:, :D]
        if use_classification_head:
            return out, jnp.squeeze(up[:, D:D + 1])   # matches torch .squeeze()
        return out

    out = heads_nchw[:, :D].astype(jnp.float32)
    if use_classification_head:
        return out, jnp.squeeze(heads_nchw[:, D:D + 1].astype(jnp.float32))
    return out


# ---------------------------------------------------------------------------
# Pure-JAX f32 reference (for checking the Pallas path)
# ---------------------------------------------------------------------------
def _ref_conv(x, w, b, stride, pad, relu):
    y = jax.lax.conv_general_dilated(
        x, w, window_strides=(stride, stride),
        padding=((pad, pad), (pad, pad)),
        dimension_numbers=('NCHW', 'OIHW', 'NCHW'))
    y = y + b.reshape(1, -1, 1, 1)
    return jnp.maximum(y, 0.0) if relu else y


def _ref_resize(x, out_h, out_w):
    N, C, H, W = x.shape
    ah = jnp.asarray(_bilinear_matrix(out_h, H))
    aw = jnp.asarray(_bilinear_matrix(out_w, W))
    return jnp.einsum('oh,nchw,pw->ncop', ah, x, aw)


def reference_forward(x, params):
    feats = _ref_conv(x, params['backbone_w'], params['backbone_b'], 2, 1, True)
    emb = _ref_conv(feats, params['decoder_w'], params['decoder_b'], 1, 1, True)
    out = _ref_conv(emb, params['head_w'], params['head_b'], 1, 0, False)
    sal = _ref_conv(emb, params['cls_w'],
                    jnp.zeros((1,), jnp.float32), 1, 0, False)
    out = _ref_resize(out, x.shape[-2], x.shape[-1])
    sal = _ref_resize(sal, x.shape[-2], x.shape[-1])
    return out, jnp.squeeze(sal)


# ---------------------------------------------------------------------------
if __name__ == "__main__":
    N, Cin, H, W = 2, 4, 16, 16        # input x: [2, 4, 16, 16]  (NCHW)
    Cb, Ce, D = 32, 32, 32             # backbone feats, embedding, head dim

    key = jax.random.PRNGKey(0)
    ks = jax.random.split(key, 8)

    def init_w(k, cout, cin, kh, kw):
        fan_in = cin * kh * kw
        return (jax.random.normal(k, (cout, cin, kh, kw), jnp.float32)
                / math.sqrt(fan_in))

    def init_b(k, cout, fan_in):
        bound = 1.0 / math.sqrt(fan_in)
        return jax.random.uniform(k, (cout,), jnp.float32, -bound, bound)

    params = {
        'backbone_w': init_w(ks[0], Cb, Cin, 3, 3),
        'backbone_b': init_b(ks[1], Cb, Cin * 9),
        'decoder_w':  init_w(ks[2], Ce, Cb, 3, 3),
        'decoder_b':  init_b(ks[3], Ce, Cb * 9),
        'head_w':     init_w(ks[4], D, Ce, 1, 1),
        'head_b':     init_b(ks[5], D, Ce),
        'cls_w':      init_w(ks[6], 1, Ce, 1, 1),   # bias=False
    }

    x = jax.random.normal(ks[7], (N, Cin, H, W), jnp.float32)

    fwd = jax.jit(lambda xx, pp: contrastive_segmentation_forward(xx, pp))
    out, sal = fwd(x, params)
    out = jax.block_until_ready(out)
    sal = jax.block_until_ready(sal)

    assert out.shape == (N, D, H, W), out.shape
    assert sal.shape == (N, H, W), sal.shape

    ref_out, ref_sal = reference_forward(x, params)
    # bf16 MXU inputs / bf16 intermediates with f32 accumulation -> loosened
    # tolerance vs the f32 reference.
    np.testing.assert_allclose(np.asarray(out), np.asarray(ref_out),
                               rtol=5e-2, atol=5e-2)
    np.testing.assert_allclose(np.asarray(sal), np.asarray(ref_sal),
                               rtol=5e-2, atol=5e-2)

    print("KERNEL_OK")
</pallas_src>

<mosaic_0001>
module attributes {stable_mosaic.version = 11 : i64} {
  func.func @_matmul_bias_act_kernel(%arg0: i32, %arg1: memref<64x128xbf16, #tpu.memory_space<vmem>>, %arg2: memref<128x128xbf16, #tpu.memory_space<vmem>>, %arg3: memref<1x128xf32, #tpu.memory_space<vmem>>, %arg4: memref<64x128xbf16, #tpu.memory_space<vmem>>) attributes {dimension_semantics = [#tpu.dimension_semantics<parallel>], iteration_bounds = array<i64: 2>, scalar_prefetch = 0 : i64, scratch_operands = 0 : i64, tpu.core_type = #tpu.core_type<tc>, window_params = [{transform_indices = @transform_0, window_bounds = array<i64: 64, 128>}, {pipeline_mode = #tpu.pipeline_mode<synchronous>, transform_indices = @transform_1, window_bounds = array<i64: 128, 128>}, {pipeline_mode = #tpu.pipeline_mode<synchronous>, transform_indices = @transform_2, window_bounds = array<i64: 1, 128>}, {transform_indices = @transform_3, window_bounds = array<i64: 64, 128>}]} {
    %c0 = arith.constant 0 : index
    %c0_0 = arith.constant 0 : index
    %0 = vector.load %arg1[%c0, %c0_0] : memref<64x128xbf16, #tpu.memory_space<vmem>>, vector<64x128xbf16>
    %c0_1 = arith.constant 0 : index
    %c0_2 = arith.constant 0 : index
    %1 = vector.load %arg2[%c0_1, %c0_2] : memref<128x128xbf16, #tpu.memory_space<vmem>>, vector<128x128xbf16>
    %cst = arith.constant dense<0.000000e+00> : vector<64x128xf32>
    %2 = tpu.matmul %0, %1, %cst {dimension_numbers = #tpu.dot_dimension_numbers<[1], [0], [0], [1], [0, 0, 1, 1], [], []>} : vector<64x128xbf16>, vector<128x128xbf16>, vector<64x128xf32> -> vector<64x128xf32>
    %c0_3 = arith.constant 0 : index
    %c0_4 = arith.constant 0 : index
    %3 = vector.load %arg3[%c0_3, %c0_4] : memref<1x128xf32, #tpu.memory_space<vmem>>, vector<1x128xf32>
    %4 = vector.broadcast %3 : vector<1x128xf32> to vector<64x128xf32>
    %5 = arith.addf %2, %4 : vector<64x128xf32>
    %cst_5 = arith.constant 0.000000e+00 : f32
    %6 = vector.broadcast %cst_5 : f32 to vector<64x128xf32>
    %7 = arith.maximumf %5, %6 : vector<64x128xf32>
    %8 = arith.truncf %7 : vector<64x128xf32> to vector<64x128xbf16>
    %c0_6 = arith.constant 0 : index
    %c0_7 = arith.constant 0 : index
    %9 = vector.load %arg4[%c0_6, %c0_7] : memref<64x128xbf16, #tpu.memory_space<vmem>>, vector<64x128xbf16>
    tpu.vector_store %arg4[%c0_6, %c0_7], %8 {strides = array<i32>} : memref<64x128xbf16, #tpu.memory_space<vmem>>, vector<64x128xbf16>,
    return
  }
  func.func @transform_0(%arg0: i32) -> (i32, i32) {
    %c0_i32 = arith.constant 0 : i32
    %c0_i32_0 = arith.constant 0 : i32
    return %arg0, %c0_i32 : i32, i32
  }
  func.func @transform_1(%arg0: i32) -> (i32, i32) {
    %c0_i32 = arith.constant 0 : i32
    %c0_i32_0 = arith.constant 0 : i32
    %c0_i32_1 = arith.constant 0 : i32
    return %c0_i32, %c0_i32_0 : i32, i32
  }
  func.func @transform_2(%arg0: i32) -> (i32, i32) {
    %c0_i32 = arith.constant 0 : i32
    %c0_i32_0 = arith.constant 0 : i32
    %c0_i32_1 = arith.constant 0 : i32
    return %c0_i32, %c0_i32_0 : i32, i32
  }
  func.func @transform_3(%arg0: i32) -> (i32, i32) {
    %c0_i32 = arith.constant 0 : i32
    %c0_i32_0 = arith.constant 0 : i32
    return %arg0, %c0_i32 : i32, i32
  }
}

module attributes {stable_mosaic.version = 11 : i64} {
  func.func @_matmul_bias_act_kernel(%arg0: i32, %arg1: memref<64x288xbf16, #tpu.memory_space<vmem>>, %arg2: memref<288x128xbf16, #tpu.memory_space<vmem>>, %arg3: memref<1x128xf32, #tpu.memory_space<vmem>>, %arg4: memref<64x128xbf16, #tpu.memory_space<vmem>>) attributes {dimension_semantics = [#tpu.dimension_semantics<parallel>], iteration_bounds = array<i64: 2>, scalar_prefetch = 0 : i64, scratch_operands = 0 : i64, tpu.core_type = #tpu.core_type<tc>, window_params = [{transform_indices = @transform_0, window_bounds = array<i64: 64, 288>}, {pipeline_mode = #tpu.pipeline_mode<synchronous>, transform_indices = @transform_1, window_bounds = array<i64: 288, 128>}, {pipeline_mode = #tpu.pipeline_mode<synchronous>, transform_indices = @transform_2, window_bounds = array<i64: 1, 128>}, {transform_indices = @transform_3, window_bounds = array<i64: 64, 128>}]} {
    %c0 = arith.constant 0 : index
    %c0_0 = arith.constant 0 : index
    %0 = vector.load %arg1[%c0, %c0_0] : memref<64x288xbf16, #tpu.memory_space<vmem>>, vector<64x288xbf16>
    %c0_1 = arith.constant 0 : index
    %c0_2 = arith.constant 0 : index
    %1 = vector.load %arg2[%c0_1, %c0_2] : memref<288x128xbf16, #tpu.memory_space<vmem>>, vector<288x128xbf16>
    %cst = arith.constant dense<0.000000e+00> : vector<64x128xf32>
    %2 = tpu.matmul %0, %1, %cst {dimension_numbers = #tpu.dot_dimension_numbers<[1], [0], [0], [1], [0, 0, 1, 1], [], []>} : vector<64x288xbf16>, vector<288x128xbf16>, vector<64x128xf32> -> vector<64x128xf32>
    %c0_3 = arith.constant 0 : index
    %c0_4 = arith.constant 0 : index
    %3 = vector.load %arg3[%c0_3, %c0_4] : memref<1x128xf32, #tpu.memory_space<vmem>>, vector<1x128xf32>
    %4 = vector.broadcast %3 : vector<1x128xf32> to vector<64x128xf32>
    %5 = arith.addf %2, %4 : vector<64x128xf32>
    %cst_5 = arith.constant 0.000000e+00 : f32
    %6 = vector.broadcast %cst_5 : f32 to vector<64x128xf32>
    %7 = arith.maximumf %5, %6 : vector<64x128xf32>
    %8 = arith.truncf %7 : vector<64x128xf32> to vector<64x128xbf16>
    %c0_6 = arith.constant 0 : index
    %c0_7 = arith.constant 0 : index
    %9 = vector.load %arg4[%c0_6, %c0_7] : memref<64x128xbf16, #tpu.memory_space<vmem>>, vector<64x128xbf16>
    tpu.vector_store %arg4[%c0_6, %c0_7], %8 {strides = array<i32>} : memref<64x128xbf16, #tpu.memory_space<vmem>>, vector<64x128xbf16>,
    return
  }
  func.func @transform_0(%arg0: i32) -> (i32, i32) {
    %c0_i32 = arith.constant 0 : i32
    %c0_i32_0 = arith.constant 0 : i32
    return %arg0, %c0_i32 : i32, i32
  }
  func.func @transform_1(%arg0: i32) -> (i32, i32) {
    %c0_i32 = arith.constant 0 : i32
    %c0_i32_0 = arith.constant 0 : i32
    %c0_i32_1 = arith.constant 0 : i32
    return %c0_i32, %c0_i32_0 : i32, i32
  }
  func.func @transform_2(%arg0: i32) -> (i32, i32) {
    %c0_i32 = arith.constant 0 : i32
    %c0_i32_0 = arith.constant 0 : i32
    %c0_i32_1 = arith.constant 0 : i32
    return %c0_i32, %c0_i32_0 : i32, i32
  }
  func.func @transform_3(%arg0: i32) -> (i32, i32) {
    %c0_i32 = arith.constant 0 : i32
    %c0_i32_0 = arith.constant 0 : i32
    return %arg0, %c0_i32 : i32, i32
  }
}

module attributes {stable_mosaic.version = 11 : i64} {
  func.func @_matmul_bias_act_kernel(%arg0: i32, %arg1: memref<64x128xbf16, #tpu.memory_space<vmem>>, %arg2: memref<128x128xbf16, #tpu.memory_space<vmem>>, %arg3: memref<1x128xf32, #tpu.memory_space<vmem>>, %arg4: memref<64x128xbf16, #tpu.memory_space<vmem>>) attributes {dimension_semantics = [#tpu.dimension_semantics<parallel>], iteration_bounds = array<i64: 2>, scalar_prefetch = 0 : i64, scratch_operands = 0 : i64, tpu.core_type = #tpu.core_type<tc>, window_params = [{transform_indices = @transform_0, window_bounds = array<i64: 64, 128>}, {pipeline_mode = #tpu.pipeline_mode<synchronous>, transform_indices = @transform_1, window_bounds = array<i64: 128, 128>}, {pipeline_mode = #tpu.pipeline_mode<synchronous>, transform_indices = @transform_2, window_bounds = array<i64: 1, 128>}, {transform_indices = @transform_3, window_bounds = array<i64: 64, 128>}]} {
    %c0 = arith.constant 0 : index
    %c0_0 = arith.constant 0 : index
    %0 = vector.load %arg1[%c0, %c0_0] : memref<64x128xbf16, #tpu.memory_space<vmem>>, vector<64x128xbf16>
    %c0_1 = arith.constant 0 : index
    %c0_2 = arith.constant 0 : index
    %1 = vector.load %arg2[%c0_1, %c0_2] : memref<128x128xbf16, #tpu.memory_space<vmem>>, vector<128x128xbf16>
    %cst = arith.constant dense<0.000000e+00> : vector<64x128xf32>
    %2 = tpu.matmul %0, %1, %cst {dimension_numbers = #tpu.dot_dimension_numbers<[1], [0], [0], [1], [0, 0, 1, 1], [], []>} : vector<64x128xbf16>, vector<128x128xbf16>, vector<64x128xf32> -> vector<64x128xf32>
    %c0_3 = arith.constant 0 : index
    %c0_4 = arith.constant 0 : index
    %3 = vector.load %arg3[%c0_3, %c0_4] : memref<1x128xf32, #tpu.memory_space<vmem>>, vector<1x128xf32>
    %4 = vector.broadcast %3 : vector<1x128xf32> to vector<64x128xf32>
    %5 = arith.addf %2, %4 : vector<64x128xf32>
    %6 = arith.truncf %5 : vector<64x128xf32> to vector<64x128xbf16>
    %c0_5 = arith.constant 0 : index
    %c0_6 = arith.constant 0 : index
    %7 = vector.load %arg4[%c0_5, %c0_6] : memref<64x128xbf16, #tpu.memory_space<vmem>>, vector<64x128xbf16>
    tpu.vector_store %arg4[%c0_5, %c0_6], %6 {strides = array<i32>} : memref<64x128xbf16, #tpu.memory_space<vmem>>, vector<64x128xbf16>,
    return
  }
  func.func @transform_0(%arg0: i32) -> (i32, i32) {
    %c0_i32 = arith.constant 0 : i32
    %c0_i32_0 = arith.constant 0 : i32
    return %arg0, %c0_i32 : i32, i32
  }
  func.func @transform_1(%arg0: i32) -> (i32, i32) {
    %c0_i32 = arith.constant 0 : i32
    %c0_i32_0 = arith.constant 0 : i32
    %c0_i32_1 = arith.constant 0 : i32
    return %c0_i32, %c0_i32_0 : i32, i32
  }
  func.func @transform_2(%arg0: i32) -> (i32, i32) {
    %c0_i32 = arith.constant 0 : i32
    %c0_i32_0 = arith.constant 0 : i32
    %c0_i32_1 = arith.constant 0 : i32
    return %c0_i32, %c0_i32_0 : i32, i32
  }
  func.func @transform_3(%arg0: i32) -> (i32, i32) {
    %c0_i32 = arith.constant 0 : i32
    %c0_i32_0 = arith.constant 0 : i32
    return %arg0, %c0_i32 : i32, i32
  }
}

module attributes {stable_mosaic.version = 11 : i64} {
  func.func @_bilinear_nchw_kernel(%arg0: i32, %arg1: i32, %arg2: i32, %arg3: memref<1x8x8x8xbf16, #tpu.memory_space<vmem>>, %arg4: memref<16x8xbf16, #tpu.memory_space<vmem>>, %arg5: memref<8x16xbf16, #tpu.memory_space<vmem>>, %arg6: memref<1x8x16x16xf32, #tpu.memory_space<vmem>>) attributes {dimension_semantics = [#tpu.dimension_semantics<parallel>, #tpu.dimension_semantics<parallel>, #tpu.dimension_semantics<parallel>], iteration_bounds = array<i64: 2, 5, 1>, scalar_prefetch = 0 : i64, scratch_operands = 0 : i64, tpu.core_type = #tpu.core_type<tc>, window_params = [{transform_indices = @transform_0, window_bounds = array<i64: 1, 8, 8, 8>}, {transform_indices = @transform_1, window_bounds = array<i64: 16, 8>}, {pipeline_mode = #tpu.pipeline_mode<synchronous>, transform_indices = @transform_2, window_bounds = array<i64: 8, 16>}, {transform_indices = @transform_3, window_bounds = array<i64: 1, 8, 16, 16>}]} {
    %c0 = arith.constant 0 : index
    %c0_0 = arith.constant 0 : index
    %c0_1 = arith.constant 0 : index
    %c0_2 = arith.constant 0 : index
    %0 = vector.load %arg3[%c0, %c0_0, %c0_1, %c0_2] : memref<1x8x8x8xbf16, #tpu.memory_space<vmem>>, vector<1x8x8x8xbf16>
    %1 = vector.shape_cast %0 : vector<1x8x8x8xbf16> to vector<8x8x8xbf16>
    %c0_3 = arith.constant 0 : index
    %c0_4 = arith.constant 0 : index
    %2 = vector.load %arg4[%c0_3, %c0_4] : memref<16x8xbf16, #tpu.memory_space<vmem>>, vector<16x8xbf16>
    %c0_5 = arith.constant 0 : index
    %c0_6 = arith.constant 0 : index
    %3 = vector.load %arg5[%c0_5, %c0_6] : memref<8x16xbf16, #tpu.memory_space<vmem>>, vector<8x16xbf16>
    %4 = vector.shape_cast %2 : vector<16x8xbf16> to vector<1x16x8xbf16>
    %5 = vector.shape_cast %4 : vector<1x16x8xbf16> to vector<1x16x8xbf16>
    %6 = vector.broadcast %5 : vector<1x16x8xbf16> to vector<8x16x8xbf16>
    %cst = arith.constant dense<0.000000e+00> : vector<8x16x8xf32>
    %7 = tpu.matmul %6, %1, %cst {dimension_numbers = #tpu.dot_dimension_numbers<[2], [1], [1], [2], [0, 0, 0, 1, 1, 2], [0], [0]>} : vector<8x16x8xbf16>, vector<8x8x8xbf16>, vector<8x16x8xf32> -> vector<8x16x8xf32>
    %8 = arith.truncf %7 : vector<8x16x8xf32> to vector<8x16x8xbf16>
    %9 = vector.shape_cast %8 : vector<8x16x8xbf16> to vector<128x8xbf16>
    %cst_7 = arith.constant dense<0.000000e+00> : vector<128x16xf32>
    %10 = tpu.matmul %9, %3, %cst_7 {dimension_numbers = #tpu.dot_dimension_numbers<[1], [0], [0], [1], [0, 0, 1, 1], [], []>} : vector<128x8xbf16>, vector<8x16xbf16>, vector<128x16xf32> -> vector<128x16xf32>
    %11 = vector.shape_cast %10 : vector<128x16xf32> to vector<8x16x16xf32>
    %c0_8 = arith.constant 0 : index
    %c0_9 = arith.constant 0 : index
    %c0_10 = arith.constant 0 : index
    %c0_11 = arith.constant 0 : index
    %12 = vector.load %arg6[%c0_8, %c0_9, %c0_10, %c0_11] : memref<1x8x16x16xf32, #tpu.memory_space<vmem>>, vector<1x8x16x16xf32>
    %13 = vector.shape_cast %12 : vector<1x8x16x16xf32> to vector<8x16x16xf32>
    %14 = vector.shape_cast %11 : vector<8x16x16xf32> to vector<1x8x16x16xf32>
    tpu.vector_store %arg6[%c0_8, %c0_9, %c0_10, %c0_11], %14 {strides = array<i32>} : memref<1x8x16x16xf32, #tpu.memory_space<vmem>>, vector<1x8x16x16xf32>,
    return
  }
  func.func @transform_0(%arg0: i32, %arg1: i32, %arg2: i32) -> (i32, i32, i32, i32) {
    %c0_i32 = arith.constant 0 : i32
    %c0_i32_0 = arith.constant 0 : i32
    %c0_i32_1 = arith.constant 0 : i32
    return %arg0, %arg1, %c0_i32, %c0_i32_0 : i32, i32, i32, i32
  }
  func.func @transform_1(%arg0: i32, %arg1: i32, %arg2: i32) -> (i32, i32) {
    %c0_i32 = arith.constant 0 : i32
    %c0_i32_0 = arith.constant 0 : i32
    return %arg2, %c0_i32 : i32, i32
  }
  func.func @transform_2(%arg0: i32, %arg1: i32, %arg2: i32) -> (i32, i32) {
    %c0_i32 = arith.constant 0 : i32
    %c0_i32_0 = arith.constant 0 : i32
    %c0_i32_1 = arith.constant 0 : i32
    return %c0_i32, %c0_i32_0 : i32, i32
  }
  func.func @transform_3(%arg0: i32, %arg1: i32, %arg2: i32) -> (i32, i32, i32, i32) {
    %c0_i32 = arith.constant 0 : i32
    %c0_i32_0 = arith.constant 0 : i32
    return %arg0, %arg1, %arg2, %c0_i32 : i32, i32, i32, i32
  }
}

</mosaic_0001>

<bundles_post_ra>
// kernel: _lambda_.4
= control target key start
LH: loop header
LB: loop body
LE: loop exit
PB: predicated region body
PF: predicated region fallthrough
CT: control target
= control target key end

     0   :  { %s610_s12 = smov 0   ;;  %s667_s0 = inlined_call_operand.vmem [shape: bf16[128,128], index: 0, kind: input, shape index: {}]   ;;  %s668_s1 = inlined_call_operand.vmem [shape: bf16[128,128], index: 1, kind: input, shape index: {}]   ;;  %s669_s2 = inlined_call_operand.vmem [shape: f32[1,128], index: 2, kind: input, shape index: {}]   ;;  %s670_s3 = inlined_call_operand.vmem [shape: bf16[128,128], index: 3, kind: output, shape index: {}]  }
   0x1 LB: > { %s447_s13 = sadd.s32 4294967295, %s588_s12   ;;  %p451_p0 = scmp.ge.s32.totalorder %s588_s12, 1  ;;  %s588_s12 = sphi %s610_s12, %s13_s12  }
   0x2   : > { %p138_p1 = scmp.lt.s32.totalorder %s588_s12, 3 }
   0x4   : > { %p139_p2 = pnand %p451_p0, %p138_p1 }
   0x5   : > { %v570_v0 = vld [vmem:[%s668_s1] sm:$0xff] (!%p139_p2)   ;;  %s452_s16 = sshll.u32 (!%p139_p2), %s447_s13, 3  ;;  %v571_v1 = vld [vmem:[%s668_s1 + $0x8] sm:$0xff] (!%p139_p2)   ;;  %v572_v2 = vld [vmem:[%s668_s1 + $0x10] sm:$0xff] (!%p139_p2)  }
   0x6   : > { %142 = sbr.rel (%p139_p2) target bundleno = 260 (0x104), region = 32  ;;  %p163_p3 = scmp.lt.s32.totalorder (!%p139_p2), %s452_s16, 15  ;;  %522 = vmatprep.subr.bf16.mxu0 (!%p139_p2), %v570_v0  ;;  %546 = vmatprep.subr.bf16.mxu1 (!%p139_p2), %v570_v0  ;;  %v573_v3 = vld [vmem:[%s668_s1 + $0x18] sm:$0xff] (!%p139_p2)   ;;  %v574_v6 = vld [vmem:[%s668_s1 + $0x20] sm:$0xff] (!%p139_p2)   ;;  %v575_v7 = vld [vmem:[%s668_s1 + $0x28] sm:$0xff] (!%p139_p2)  }
   0x7   : > { %523 = vmatpush3.bf16.msra.mxu0 (!%p139_p2), %v570_v0  ;;  %554 = vmatpush3.bf16.msra.mxu1 (!%p139_p2), %v570_v0  ;;  %v576_v8 = vld [vmem:[%s668_s1 + $0x30] sm:$0xff] (!%p139_p2)   ;;  %v577_v9 = vld [vmem:[%s668_s1 + $0x38] sm:$0xff] (!%p139_p2)   ;;  %v456_v12 = vld [vmem:[%s669_s2] ss:$0 sm:$0xff] (!%p139_p2) }
   0x8   : > { %524 = vmatprep.subr.bf16.mxu0 (!%p139_p2), %v571_v1  ;;  %547 = vmatprep.subr.bf16.mxu1 (!%p139_p2), %v571_v1 }
   0xb   : > { %525 = vmatpush3.bf16.msra.mxu0 (!%p139_p2), %v571_v1  ;;  %555 = vmatpush3.bf16.msra.mxu1 (!%p139_p2), %v571_v1 }
   0xc   : > { %526 = vmatprep.subr.bf16.mxu0 (!%p139_p2), %v572_v2  ;;  %548 = vmatprep.subr.bf16.mxu1 (!%p139_p2), %v572_v2 }
   0xd   : > { %s672_s16 = smov (!%p163_p3, %s452_s16), 15 }
   0xe   : > { %s453_s21 = sshll.u32 %s672_s16, 2 }
   0xf   : > { %s635_s24 = scalar_lea.vmem %s667_s0, %s453_s21  ;;  %527 = vmatpush3.bf16.msra.mxu0 %v572_v2  ;;  %556 = vmatpush3.bf16.msra.mxu1 %v572_v2  ;;  %s172_s13 = scalar_lea.vmem %s670_s3, %s453_s21 }
  0x10   : > { %v578_v4 = vld [vmem:[%s635_s24] sm:$0xff]   ;;  %v579_v5 = vld [vmem:[%s635_s24 + $0x10] sm:$0xff]   ;;  %528 = vmatprep.subr.bf16.mxu0 %v573_v3  ;;  %549 = vmatprep.subr.bf16.mxu1 %v573_v3  ;;  %v580_v10 = vld [vmem:[%s635_s24 + $0x8] sm:$0xff]  }
  0x11   : > { %538 = vmatprep.mubr.bf16.mxu0 %v578_v4  ;;  %542 = vmatprep.mubr.bf16.mxu1 %v579_v5  ;;  %v581_v11 = vld [vmem:[%s635_s24 + $0x18] sm:$0xff]  }
  0x13   : > { %529 = vmatpush3.bf16.msra.mxu0 %v573_v3  ;;  %557 = vmatpush3.bf16.msra.mxu1 %v573_v3 }
  0x14   : > { %530 = vmatprep.subr.bf16.mxu0 %v574_v6  ;;  %550 = vmatprep.subr.bf16.mxu1 %v574_v6 }
  0x17   : > { %531 = vmatpush3.bf16.msra.mxu0 %v574_v6  ;;  %558 = vmatpush3.bf16.msra.mxu1 %v574_v6 }
  0x18   : > { %532 = vmatprep.subr.bf16.mxu0 %v575_v7  ;;  %551 = vmatprep.subr.bf16.mxu1 %v575_v7 }
  0x1b   : > { %533 = vmatpush3.bf16.msra.mxu0 %v575_v7  ;;  %559 = vmatpush3.bf16.msra.mxu1 %v575_v7 }
  0x1c   : > { %534 = vmatprep.subr.bf16.mxu0 %v576_v8  ;;  %552 = vmatprep.subr.bf16.mxu1 %v576_v8 }
  0x1f   : > { %535 = vmatpush3.bf16.msra.mxu0 %v576_v8  ;;  %560 = vmatpush3.bf16.msra.mxu1 %v576_v8 }
  0x20   : > { %536 = vmatprep.subr.bf16.mxu0 %v577_v9  ;;  %553 = vmatprep.subr.bf16.mxu1 %v577_v9 }
  0x23   : > { %537 = vmatpush3.bf16.msra.mxu0 %v577_v9  ;;  %561 = vmatpush3.bf16.msra.mxu1 %v577_v9 }
  0x26   : > { %539 = vmatmul.mubr.bf16.vlgmr.msra.gmra.mrb[0].mxu0 %v580_v10  ;;  %543 = vmatmul.mubr.bf16.vlgmr.msra.gmra.mrb[0].mxu1 %v581_v11 }
  0xf9   : > { %v540_v13 = vpop.f32.mrb[0].mxu0  ;;  %v544_v14 = vpop.f32.mrb[0].mxu1 }
  0xfa   : > { %v321_v15 = vadd.f32 %v540_v13, %v456_v12  ;;  %v337_v16 = vadd.f32 %v544_v14, %v456_v12  ;;  %v312_v17 = vpop.f32.mrb[1].mxu0  ;;  %v328_v18 = vpop.f32.mrb[1].mxu1 }
  0xfb   : > { %v313_v19 = vadd.f32 %v456_v12, %v312_v17  ;;  %v329_v20 = vadd.f32 %v456_v12, %v328_v18  ;;  %v541_v21 = vpop.f32.mrb[2].mxu0  ;;  %v545_v22 = vpop.f32.mrb[2].mxu1 }
  0xfc   : > { %v324_v23 = vadd.f32 %v541_v21, %v456_v12  ;;  %v340_v24 = vadd.f32 %v545_v22, %v456_v12  ;;  %v315_v25 = vpop.f32.mrb[3].mxu0  ;;  %v331_v26 = vpop.f32.mrb[3].mxu1  ;;  %v345_v29 = vmax.f32 %v321_v15, 0.0  ;;  %v349_v30 = vmax.f32 %v337_v16, 0.0 }
  0xfd   : > { %v316_v27 = vadd.f32 %v456_v12, %v315_v25  ;;  %v332_v28 = vadd.f32 %v456_v12, %v331_v26  ;;  %v343_v33 = vmax.f32 %v313_v19, 0.0  ;;  %v347_v34 = vmax.f32 %v329_v20, 0.0 }
  0xfe   : > { %v346_v31 = vmax.f32 %v324_v23, 0.0  ;;  %v350_v32 = vmax.f32 %v340_v24, 0.0 }
  0xff   : > { %v344_v35 = vmax.f32 %v316_v27, 0.0  ;;  %v348_v36 = vmax.f32 %v332_v28, 0.0 }
 0x100   : > { %v495_v37 = vpack.c.bf16 %v346_v31, %v345_v29  ;;  %v505_v38 = vpack.c.bf16 %v350_v32, %v349_v30 }
 0x101   : > { %v490_v39 = vpack.c.bf16 %v344_v35, %v343_v33  ;;  %v500_v40 = vpack.c.bf16 %v348_v36, %v347_v34 }
 0x102   : > { %507 = vst [vmem:[%s172_s13 + $0x8] sm:$0xff] %v495_v37   ;;  %509 = vst [vmem:[%s172_s13 + $0x18] sm:$0xff] %v505_v38  }
 0x103   : > { %491 = vst [vmem:[%s172_s13] sm:$0xff] %v490_v39   ;;  %508 = vst [vmem:[%s172_s13 + $0x10] sm:$0xff] %v500_v40  }
 0x104 PF: > { %s13_s12 = sadd.s32 1, %s588_s12  }
 0x105   : > { %p10_p4 = scmp.ge.s32.totalorder %s13_s12, 4  }
 0x107   :  { %12 = sbr.rel (!%p10_p4) target bundleno = 1 (0x1), region = 62 }

// kernel: _lambda_.5
= control target key start
LH: loop header
LB: loop body
LE: loop exit
PB: predicated region body
PF: predicated region fallthrough
CT: control target
= control target key end

     0   :  { %s882_s12 = smov 0   ;;  %s984_s0 = inlined_call_operand.vmem [shape: bf16[128,288], index: 0, kind: input, shape index: {}]   ;;  %s985_s1 = inlined_call_operand.vmem [shape: bf16[288,128], index: 1, kind: input, shape index: {}]   ;;  %s986_s2 = inlined_call_operand.vmem [shape: f32[1,128], index: 2, kind: input, shape index: {}]   ;;  %s987_s3 = inlined_call_operand.vmem [shape: bf16[128,128], index: 3, kind: output, shape index: {}]  }
   0x1 LB: > { %s652_s13 = sadd.s32 4294967295, %s860_s12   ;;  %p656_p0 = scmp.ge.s32.totalorder %s860_s12, 1  ;;  %s860_s12 = sphi %s882_s12, %s13_s12  }
   0x2   : > { %p139_p1 = scmp.lt.s32.totalorder %s860_s12, 3 }
   0x4   : > { %p140_p2 = pnand %p656_p0, %p139_p1 }
   0x5   : > { %v820_v0 = vld [vmem:[%s985_s1 + $0x40] sm:$0xff] (!%p140_p2)   ;;  %s657_s16 = sshll.u32 (!%p140_p2), %s652_s13, 3  ;;  %v822_v2 = vld [vmem:[%s985_s1 + $0x48] sm:$0xff] (!%p140_p2)   ;;  %v824_v4 = vld [vmem:[%s985_s1 + $0x50] sm:$0xff] (!%p140_p2)   ;;  %vm405_vm0 = vcmask (!%p140_p2), 261120  }
   0x6   : > { %143 = sbr.rel (%p140_p2) target bundleno = 280 (0x118), region = 32  ;;  %v821_v1 = vld [vmem:[%s985_s1] sm:$0xff] (!%p140_p2)   ;;  %737 = vmatprep.subr.bf16.mxu0 (!%p140_p2), %v820_v0  ;;  %795 = vmatprep.subr.bf16.mxu1 (!%p140_p2), %v820_v0  ;;  %p165_p3 = scmp.lt.s32.totalorder (!%p140_p2), %s657_s16, 15  ;;  %v823_v3 = vld [vmem:[%s985_s1 + $0x8] sm:$0xff] (!%p140_p2)   ;;  %v825_v5 = vld [vmem:[%s985_s1 + $0x10] sm:$0xff] (!%p140_p2)  }
   0x7   : > { %738 = vmatpush3.bf16.msra.mxu0 (!%p140_p2), %v821_v1  ;;  %803 = vmatpush3.bf16.msra.mxu1 (!%p140_p2), %v821_v1  ;;  %v826_v6 = vld [vmem:[%s985_s1 + $0x58] sm:$0xff] (!%p140_p2)   ;;  %v828_v8 = vld [vmem:[%s985_s1 + $0x60] sm:$0xff] (!%p140_p2)   ;;  %v830_v10 = vld [vmem:[%s985_s1 + $0x68] sm:$0xff] (!%p140_p2)  }
   0x8   : > { %739 = vmatprep.subr.bf16.mxu0 (!%p140_p2), %v822_v2  ;;  %796 = vmatprep.subr.bf16.mxu1 (!%p140_p2), %v822_v2  ;;  %v827_v7 = vld [vmem:[%s985_s1 + $0x18] sm:$0xff] (!%p140_p2)   ;;  %v829_v9 = vld [vmem:[%s985_s1 + $0x20] sm:$0xff] (!%p140_p2)   ;;  %v831_v13 = vld [vmem:[%s985_s1 + $0x28] sm:$0xff] (!%p140_p2)  }
   0x9   : > { %v832_v14 = vld [vmem:[%s985_s1 + $0x70] sm:$0xff] (!%p140_p2)   ;;  %v834_v16 = vld [vmem:[%s985_s1 + $0x78] sm:$0xff] (!%p140_p2)   ;;  %v842_v18 = vld [vmem:[%s985_s1 + $0x80] sm:$0xff] (!%p140_p2)  }
   0xa   : > { %v833_v15 = vld [vmem:[%s985_s1 + $0x30] sm:$0xff] (!%p140_p2)   ;;  %v835_v17 = vld [vmem:[%s985_s1 + $0x38] sm:$0xff] (!%p140_p2)   ;;  %v843_v22 = vld [vmem:[%s985_s1 + $0x88] sm:$0xff] (!%p140_p2)  }
   0xb   : > { %740 = vmatpush3.bf16.msra.mxu0 (!%p140_p2), %v823_v3  ;;  %804 = vmatpush3.bf16.msra.mxu1 (!%p140_p2), %v823_v3  ;;  %v661_v42 = vld [vmem:[%s986_s2] ss:$0 sm:$0xff] (!%p140_p2) }
   0xc   : > { %741 = vmatprep.subr.bf16.mxu0 (!%p140_p2), %v824_v4  ;;  %797 = vmatprep.subr.bf16.mxu1 (!%p140_p2), %v824_v4 }
   0xd   : > { %s989_s16 = smov (!%p165_p3, %s657_s16), 15 }
   0xe   : > { %s811_s29 = smul.u32 12, %s989_s16  ;;  %s660_s5 = sshll.u32 %s989_s16, 2 }
   0xf   : > { %742 = vmatpush3.bf16.msra.mxu0 %v825_v5  ;;  %805 = vmatpush3.bf16.msra.mxu1 %v825_v5  ;;  %s975_s8 = scalar_lea.vmem %s987_s3, %s660_s5 }
  0x10   : > { %743 = vmatprep.subr.bf16.mxu0 %v826_v6  ;;  %798 = vmatprep.subr.bf16.mxu1 %v826_v6  ;;  %s923_s9 = scalar_lea.vmem %s984_s0, %s811_s29 }
  0x11   : > { %v838_v11 = vld [vmem:[%s923_s9 + $0x4] ss:$12 sps:$4 sm:$0xff]   ;;  %v841_v12 = vld [vmem:[%s923_s9 + $0x4c] ss:$12 sps:$4 sm:$0xff]   ;;  %v839_v20 = vld [vmem:[%s923_s9 + $0x48] ss:$12 sps:$4 sm:$0xff]  }
  0x12   : > { %450 = vmatprep.mubr.bf16.mxu0 %v838_v11  ;;  %474 = vmatprep.mubr.bf16.mxu1 %v841_v12  ;;  %v836_v19 = vld [vmem:[%s923_s9] ss:$12 sps:$4 sm:$0xff]   ;;  %v844_v21 = vld [vmem:[%s923_s9 + $0x1c] ss:$12 sps:$4 sm:$0xff]   ;;  %v847_v24 = vld [vmem:[%s923_s9 + $0x18] ss:$12 sps:$4 sm:$0xff]  }
  0x13   : > { %744 = vmatpush3.bf16.msra.mxu0 %v827_v7  ;;  %806 = vmatpush3.bf16.msra.mxu1 %v827_v7  ;;  %v846_v23 = vld [vmem:[%s923_s9 + $0x8] ss:$12 sps:$4 sm:$0xff]   ;;  %v848_v25 = vld [vmem:[%s923_s9 + $0x20] ss:$12 sps:$4 sm:$0xff]   ;;  %v851_v27 = vld [vmem:[%s923_s9 + $0x38] ss:$12 sps:$4 sm:$0xff]  }
  0x14   : > { %745 = vmatprep.subr.bf16.mxu0 %v828_v8  ;;  %799 = vmatprep.subr.bf16.mxu1 %v828_v8  ;;  %v849_v26 = vld [vmem:[%s923_s9 + $0x34] ss:$12 sps:$4 sm:$0xff]   ;;  %v852_v28 = vld [vmem:[%s923_s9 + $0x30] ss:$12 sps:$4 sm:$0xff]  }
  0x15   : > { %v853_v29 = vld [vmem:[%s923_s9 + $0x50] ss:$12 sps:$4 sm:$0xff]  }
  0x17   : > { %746 = vmatpush3.bf16.msra.mxu0 %v829_v9  ;;  %807 = vmatpush3.bf16.msra.mxu1 %v829_v9 }
  0x18   : > { %747 = vmatprep.subr.bf16.mxu0 %v830_v10  ;;  %800 = vmatprep.subr.bf16.mxu1 %v830_v10 }
  0x1b   : > { %748 = vmatpush3.bf16.msra.mxu0 %v831_v13  ;;  %808 = vmatpush3.bf16.msra.mxu1 %v831_v13 }
  0x1c   : > { %749 = vmatprep.subr.bf16.mxu0 %v832_v14  ;;  %801 = vmatprep.subr.bf16.mxu1 %v832_v14 }
  0x1f   : > { %750 = vmatpush3.bf16.msra.mxu0 %v833_v15  ;;  %809 = vmatpush3.bf16.msra.mxu1 %v833_v15 }
  0x20   : > { %751 = vmatprep.subr.bf16.mxu0 %v834_v16  ;;  %802 = vmatprep.subr.bf16.mxu1 %v834_v16 }
  0x23   : > { %752 = vmatpush3.bf16.msra.mxu0 %v835_v17  ;;  %810 = vmatpush3.bf16.msra.mxu1 %v835_v17 }
  0x24   : > { %783 = vmatprep.subr.bf16.mxu1 %v842_v18 }
  0x26   : > { %451 = vmatmul.mubr.bf16.vlgmr.msra.gmra.mrb[0].mxu0 %v836_v19  ;;  %475 = vmatmul.mubr.bf16.vlgmr.msra.gmra.mrb[0].mxu1 %v839_v20 }
  0x27   : > { %784 = vmatpush3.bf16.msra.mxu1 %v842_v18  ;;  %458 = vmatprep.mubr.bf16.mxu0 %v844_v21 }
  0x28   : > { %785 = vmatprep.subr.bf16.mxu1 %v843_v22  ;;  %787 = vmatprep.mubr.msk.bf16.mxu1 %vm405_vm0, %v846_v23 }
  0x2b   : > { %786 = vmatpush3.bf16.msra.mxu1 %v843_v22 }
  0x2e   : > { %459 = vmatmul.mubr.bf16.gmra.mrb[4].mxu0 %v847_v24  ;;  %788 = vmatmul.mubr.msk.bf16.vlgmr.msra.gmra.mrb[4].mxu1 %vm405_vm0, %v848_v25 }
  0x2f   : > { %466 = vmatprep.mubr.bf16.mxu0 %v849_v26  ;;  %791 = vmatprep.mubr.msk.bf16.mxu1 %vm405_vm0, %v851_v27 }
  0x36   : > { %467 = vmatmul.mubr.bf16.gmra.mrb[8].mxu0 %v852_v28  ;;  %792 = vmatmul.mubr.msk.bf16.gmra.mrb[8].mxu1 %vm405_vm0, %v853_v29 }
  0xf9   : > { %v753_v30 = vpop.f32.mrb[0].mxu0  ;;  %v771_v31 = vpop.f32.mrb[0].mxu1 }
  0xfa   : > { %v754_v32 = vpop.f32.mrb[1].mxu0  ;;  %v772_v33 = vpop.f32.mrb[1].mxu1 }
  0xfb   : > { %v755_v34 = vadd.f32 %v754_v32, %v753_v30  ;;  %v756_v35 = vpop.f32.mrb[2].mxu0  ;;  %v773_v36 = vadd.f32 %v772_v33, %v771_v31  ;;  %v774_v37 = vpop.f32.mrb[2].mxu1 }
  0xfc   : > { %v757_v38 = vpop.f32.mrb[3].mxu0  ;;  %v775_v39 = vpop.f32.mrb[3].mxu1 }
  0xfd   : > { %v758_v40 = vadd.f32 %v757_v38, %v756_v35  ;;  %v776_v41 = vadd.f32 %v775_v39, %v774_v37  ;;  %v453_v45 = vadd.f32 %v755_v34, %v661_v42  ;;  %v477_v62 = vadd.f32 %v773_v36, %v661_v42 }
  0xff   : > { %v456_v52 = vadd.f32 %v758_v40, %v661_v42  ;;  %v480_v6 = vadd.f32 %v776_v41, %v661_v42 }
 0x101   : > { %v759_v43 = vpop.f32.mrb[4].mxu0  ;;  %v789_v44 = vpop.f32.mrb[4].mxu1 }
 0x102   : > { %v760_v46 = vpop.f32.mrb[5].mxu0  ;;  %v517_v47 = vpop.f32.mrb[5].mxu1 }
 0x103   : > { %v761_v48 = vadd.f32 %v760_v46, %v759_v43  ;;  %v518_v49 = vadd.f32 %v517_v47, %v453_v45  ;;  %v762_v50 = vpop.f32.mrb[6].mxu0  ;;  %v790_v51 = vpop.f32.mrb[6].mxu1 }
 0x104   : > { %v763_v53 = vpop.f32.mrb[7].mxu0  ;;  %v520_v54 = vpop.f32.mrb[7].mxu1 }
 0x105   : > { %v461_v55 = vadd.f32 %v761_v48, %v661_v42  ;;  %v764_v56 = vadd.f32 %v763_v53, %v762_v50  ;;  %v521_v57 = vadd.f32 %v520_v54, %v456_v52  ;;  %v548_v59 = vmax.f32 %v518_v49, 0.0 }
 0x107   : > { %v526_v58 = vadd.f32 %v789_v44, %v461_v55  ;;  %v464_v60 = vadd.f32 %v764_v56, %v661_v42  ;;  %v549_v61 = vmax.f32 %v521_v57, 0.0 }
 0x109   : > { %v529_v63 = vadd.f32 %v790_v51, %v464_v60  ;;  %v717_v0 = vpack.c.bf16 %v549_v61, %v548_v59  ;;  %v765_v1 = vpop.f32.mrb[8].mxu0  ;;  %v793_v2 = vpop.f32.mrb[8].mxu1  ;;  %v550_v7 = vmax.f32 %v526_v58, 0.0 }
 0x10a   : > { %v542_v3 = vadd.f32 %v793_v2, %v477_v62  ;;  %v766_v4 = vpop.f32.mrb[9].mxu0  ;;  %v533_v5 = vpop.f32.mrb[9].mxu1 }
 0x10b   : > { %v551_v8 = vmax.f32 %v529_v63, 0.0  ;;  %718 = vst [vmem:[%s975_s8] sm:$0xff] %v717_v0   ;;  %v767_v9 = vadd.f32 %v766_v4, %v765_v1  ;;  %v768_v10 = vpop.f32.mrb[10].mxu0  ;;  %v794_v11 = vpop.f32.mrb[10].mxu1 }
 0x10c   : > { %v545_v12 = vadd.f32 %v794_v11, %v480_v6  ;;  %v769_v13 = vpop.f32.mrb[11].mxu0  ;;  %v536_v14 = vpop.f32.mrb[11].mxu1  ;;  %v554_v18 = vmax.f32 %v542_v3, 0.0 }
 0x10d   : > { %v722_v15 = vpack.c.bf16 %v551_v8, %v550_v7  ;;  %v469_v16 = vadd.f32 %v767_v9, %v661_v42  ;;  %v770_v17 = vadd.f32 %v769_v13, %v768_v10 }
 0x10e   : > { %v555_v19 = vmax.f32 %v545_v12, 0.0 }
 0x10f   : > { %734 = vst [vmem:[%s975_s8 + $0x8] sm:$0xff] %v722_v15   ;;  %v534_v20 = vadd.f32 %v533_v5, %v469_v16  ;;  %v472_v21 = vadd.f32 %v770_v17, %v661_v42 }
 0x110   : > { %v732_v22 = vpack.c.bf16 %v555_v19, %v554_v18 }
 0x111   : > { %v537_v23 = vadd.f32 %v536_v14, %v472_v21  ;;  %v552_v24 = vmax.f32 %v534_v20, 0.0 }
 0x112   : > { %736 = vst [vmem:[%s975_s8 + $0x18] sm:$0xff] %v732_v22  }
 0x113   : > { %v553_v25 = vmax.f32 %v537_v23, 0.0 }
 0x115   : > { %v727_v26 = vpack.c.bf16 %v553_v25, %v552_v24 }
 0x117   : > { %735 = vst [vmem:[%s975_s8 + $0x10] sm:$0xff] %v727_v26  }
 0x118 PF: > { %s13_s12 = sadd.s32 1, %s860_s12  }
 0x119   : > { %p10_p4 = scmp.ge.s32.totalorder %s13_s12, 4  }
 0x11b   :  { %12 = sbr.rel (!%p10_p4) target bundleno = 1 (0x1), region = 62 }

// kernel: _lambda_.6
= control target key start
LH: loop header
LB: loop body
LE: loop exit
PB: predicated region body
PF: predicated region fallthrough
CT: control target
= control target key end

     0   :  { %s602_s12 = smov 0   ;;  %s659_s0 = inlined_call_operand.vmem [shape: bf16[128,128], index: 0, kind: input, shape index: {}]   ;;  %s660_s1 = inlined_call_operand.vmem [shape: bf16[128,128], index: 1, kind: input, shape index: {}]   ;;  %s661_s2 = inlined_call_operand.vmem [shape: f32[1,128], index: 2, kind: input, shape index: {}]   ;;  %s662_s3 = inlined_call_operand.vmem [shape: bf16[128,128], index: 3, kind: output, shape index: {}]  }
   0x1 LB: > { %s439_s13 = sadd.s32 4294967295, %s580_s12   ;;  %p443_p0 = scmp.ge.s32.totalorder %s580_s12, 1  ;;  %s580_s12 = sphi %s602_s12, %s13_s12  }
   0x2   : > { %p138_p1 = scmp.lt.s32.totalorder %s580_s12, 3 }
   0x4   : > { %p139_p2 = pnand %p443_p0, %p138_p1 }
   0x5   : > { %v562_v0 = vld [vmem:[%s660_s1] sm:$0xff] (!%p139_p2)   ;;  %s444_s16 = sshll.u32 (!%p139_p2), %s439_s13, 3  ;;  %v563_v1 = vld [vmem:[%s660_s1 + $0x8] sm:$0xff] (!%p139_p2)   ;;  %v564_v2 = vld [vmem:[%s660_s1 + $0x10] sm:$0xff] (!%p139_p2)  }
   0x6   : > { %142 = sbr.rel (%p139_p2) target bundleno = 258 (0x102), region = 32  ;;  %p163_p3 = scmp.lt.s32.totalorder (!%p139_p2), %s444_s16, 15  ;;  %514 = vmatprep.subr.bf16.mxu0 (!%p139_p2), %v562_v0  ;;  %538 = vmatprep.subr.bf16.mxu1 (!%p139_p2), %v562_v0  ;;  %v565_v3 = vld [vmem:[%s660_s1 + $0x18] sm:$0xff] (!%p139_p2)   ;;  %v566_v6 = vld [vmem:[%s660_s1 + $0x20] sm:$0xff] (!%p139_p2)   ;;  %v567_v7 = vld [vmem:[%s660_s1 + $0x28] sm:$0xff] (!%p139_p2)  }
   0x7   : > { %515 = vmatpush3.bf16.msra.mxu0 (!%p139_p2), %v562_v0  ;;  %546 = vmatpush3.bf16.msra.mxu1 (!%p139_p2), %v562_v0  ;;  %v568_v8 = vld [vmem:[%s660_s1 + $0x30] sm:$0xff] (!%p139_p2)   ;;  %v569_v9 = vld [vmem:[%s660_s1 + $0x38] sm:$0xff] (!%p139_p2)   ;;  %v448_v13 = vld [vmem:[%s661_s2] ss:$0 sm:$0xff] (!%p139_p2) }
   0x8   : > { %516 = vmatprep.subr.bf16.mxu0 (!%p139_p2), %v563_v1  ;;  %539 = vmatprep.subr.bf16.mxu1 (!%p139_p2), %v563_v1 }
   0xb   : > { %517 = vmatpush3.bf16.msra.mxu0 (!%p139_p2), %v563_v1  ;;  %547 = vmatpush3.bf16.msra.mxu1 (!%p139_p2), %v563_v1 }
   0xc   : > { %518 = vmatprep.subr.bf16.mxu0 (!%p139_p2), %v564_v2  ;;  %540 = vmatprep.subr.bf16.mxu1 (!%p139_p2), %v564_v2 }
   0xd   : > { %s664_s16 = smov (!%p163_p3, %s444_s16), 15 }
   0xe   : > { %s445_s21 = sshll.u32 %s664_s16, 2 }
   0xf   : > { %s627_s24 = scalar_lea.vmem %s659_s0, %s445_s21  ;;  %519 = vmatpush3.bf16.msra.mxu0 %v564_v2  ;;  %548 = vmatpush3.bf16.msra.mxu1 %v564_v2  ;;  %s172_s13 = scalar_lea.vmem %s662_s3, %s445_s21 }
  0x10   : > { %v570_v4 = vld [vmem:[%s627_s24] sm:$0xff]   ;;  %v571_v5 = vld [vmem:[%s627_s24 + $0x10] sm:$0xff]   ;;  %520 = vmatprep.subr.bf16.mxu0 %v565_v3  ;;  %541 = vmatprep.subr.bf16.mxu1 %v565_v3  ;;  %v572_v10 = vld [vmem:[%s627_s24 + $0x8] sm:$0xff]  }
  0x11   : > { %530 = vmatprep.mubr.bf16.mxu0 %v570_v4  ;;  %534 = vmatprep.mubr.bf16.mxu1 %v571_v5  ;;  %v573_v11 = vld [vmem:[%s627_s24 + $0x18] sm:$0xff]  }
  0x13   : > { %521 = vmatpush3.bf16.msra.mxu0 %v565_v3  ;;  %549 = vmatpush3.bf16.msra.mxu1 %v565_v3 }
  0x14   : > { %522 = vmatprep.subr.bf16.mxu0 %v566_v6  ;;  %542 = vmatprep.subr.bf16.mxu1 %v566_v6 }
  0x17   : > { %523 = vmatpush3.bf16.msra.mxu0 %v566_v6  ;;  %550 = vmatpush3.bf16.msra.mxu1 %v566_v6 }
  0x18   : > { %524 = vmatprep.subr.bf16.mxu0 %v567_v7  ;;  %543 = vmatprep.subr.bf16.mxu1 %v567_v7 }
  0x1b   : > { %525 = vmatpush3.bf16.msra.mxu0 %v567_v7  ;;  %551 = vmatpush3.bf16.msra.mxu1 %v567_v7 }
  0x1c   : > { %526 = vmatprep.subr.bf16.mxu0 %v568_v8  ;;  %544 = vmatprep.subr.bf16.mxu1 %v568_v8 }
  0x1f   : > { %527 = vmatpush3.bf16.msra.mxu0 %v568_v8  ;;  %552 = vmatpush3.bf16.msra.mxu1 %v568_v8 }
  0x20   : > { %528 = vmatprep.subr.bf16.mxu0 %v569_v9  ;;  %545 = vmatprep.subr.bf16.mxu1 %v569_v9 }
  0x23   : > { %529 = vmatpush3.bf16.msra.mxu0 %v569_v9  ;;  %553 = vmatpush3.bf16.msra.mxu1 %v569_v9 }
  0x26   : > { %531 = vmatmul.mubr.bf16.vlgmr.msra.gmra.mrb[0].mxu0 %v572_v10  ;;  %535 = vmatmul.mubr.bf16.vlgmr.msra.gmra.mrb[0].mxu1 %v573_v11 }
  0xf9   : > { %v532_v12 = vpop.f32.mrb[0].mxu0  ;;  %v536_v14 = vpop.f32.mrb[0].mxu1 }
  0xfa   : > { %v312_v15 = vpop.f32.mrb[1].mxu0  ;;  %v328_v16 = vpop.f32.mrb[1].mxu1  ;;  %v321_v19 = vadd.f32 %v532_v12, %v448_v13  ;;  %v337_v20 = vadd.f32 %v536_v14, %v448_v13 }
  0xfb   : > { %v533_v17 = vpop.f32.mrb[2].mxu0  ;;  %v537_v18 = vpop.f32.mrb[2].mxu1  ;;  %v313_v25 = vadd.f32 %v448_v13, %v312_v15  ;;  %v329_v26 = vadd.f32 %v448_v13, %v328_v16 }
  0xfc   : > { %v324_v21 = vadd.f32 %v533_v17, %v448_v13  ;;  %v340_v22 = vadd.f32 %v537_v18, %v448_v13  ;;  %v315_v23 = vpop.f32.mrb[3].mxu0  ;;  %v331_v24 = vpop.f32.mrb[3].mxu1 }
  0xfd   : > { %v316_v27 = vadd.f32 %v448_v13, %v315_v23  ;;  %v332_v28 = vadd.f32 %v448_v13, %v331_v24 }
  0xfe   : > { %v487_v29 = vpack.c.bf16 %v324_v21, %v321_v19  ;;  %v497_v30 = vpack.c.bf16 %v340_v22, %v337_v20 }
  0xff   : > { %v482_v31 = vpack.c.bf16 %v316_v27, %v313_v25  ;;  %v492_v32 = vpack.c.bf16 %v332_v28, %v329_v26 }
 0x100   : > { %499 = vst [vmem:[%s172_s13 + $0x8] sm:$0xff] %v487_v29   ;;  %501 = vst [vmem:[%s172_s13 + $0x18] sm:$0xff] %v497_v30  }
 0x101   : > { %483 = vst [vmem:[%s172_s13] sm:$0xff] %v482_v31   ;;  %500 = vst [vmem:[%s172_s13 + $0x10] sm:$0xff] %v492_v32  }
 0x102 PF: > { %s13_s12 = sadd.s32 1, %s580_s12  }
 0x103   : > { %p10_p4 = scmp.ge.s32.totalorder %s13_s12, 4  }
 0x105   :  { %12 = sbr.rel (!%p10_p4) target bundleno = 1 (0x1), region = 62 }

// kernel: _lambda_.7
= control target key start
LH: loop header
LB: loop body
LE: loop exit
PB: predicated region body
PF: predicated region fallthrough
CT: control target
= control target key end

     0   :  { %s1134_s12 = smov 0   ;;  %s1136_s13 = smov 0   ;;  %s1273_s0 = inlined_call_operand.vmem [shape: bf16[2,40,8,8], index: 0, kind: input, shape index: {}]   ;;  %s1274_s1 = inlined_call_operand.vmem [shape: bf16[16,8], index: 1, kind: input, shape index: {}]   ;;  %s1275_s2 = inlined_call_operand.vmem [shape: bf16[8,16], index: 2, kind: input, shape index: {}]   ;;  %s1276_s3 = inlined_call_operand.vmem [shape: f32[2,40,16,16], index: 3, kind: output, shape index: {}]  }
   0x1   :  { %s1138_s14 = smov 0   ;;  %s1140_s15 = smov 0  }
   0x2   :  { %s1142_s16 = smov 0  }
   0x3 LB: > { %s28_s17 = sadd.s32 1, %s1102_s14  ;;  %s32_s18 = sadd.s32 1, %s1106_s15  ;;  %s1110_s16 = sphi %s1142_s16, %s13_s16   ;;  %s1106_s15 = sphi %s1140_s15, %s1280_s15   ;;  %s1102_s14 = sphi %s1138_s14, %s1279_s14   ;;  %s1098_s13 = sphi %s1136_s13, %s1278_s13   ;;  %s1094_s12 = sphi %s1134_s12, %s1277_s12  }
   0x4   : > { %p30_p0 = scmp.ge.s32.totalorder %s28_s17, 5  ;;  %p907_p1 = scmp.ge.s32.totalorder %s1110_s16, 1 }
   0x5   : > { %p178_p2 = scmp.lt.s32.totalorder %s1110_s16, 11 }
   0x6   : > { %s1282_s17 = smov (%p30_p0, %s28_s17), 0  ;;  %s1284_s18 = smov (!%p30_p0, %s32_s18), %s1106_s15 }
   0x7   : > { %p179_p3 = pnand %p907_p1, %p178_p2  ;;  %p34_p4 = scmp.ge.s32.totalorder %s1284_s18, 2 }
   0x8   : > { %s908_s19 = sshll.u32 (!%p179_p3), %s1094_s12, 3  ;;  %p221_p5 = scmp.lt.s32.totalorder (!%p179_p3), %s1098_s13, 1  ;;  %v1112_v0 = vmov (!%p179_p3), 0.0   ;;  %vm1113_vm0 = vmmov (!%p179_p3), 0   ;;  %vm273_vm1 = vcmask (!%p179_p3), 1043456   ;;  %v1071_v6 = vld [vmem:[%s1274_s1] sm:$0xff] (!%p179_p3)  }
   0x9   : > { %s1286_s18 = smov (%p34_p4, %s1284_s18), 0  ;;  %182 = sbr.rel (%p179_p3) target bundleno = 484 (0x1e4), region = 32 }
   0xa   : > { %957 = vmatprep.subr.bf16.mxu0 (!%p179_p3), %v1112_v0  ;;  %963 = vmatprep.subr.bf16.mxu1 (!%p179_p3), %v1112_v0  ;;  %p223_p6 = scmp.lt.s32.totalorder (!%p179_p3), %s908_s19, 39  ;;  %vm269_vm2 = vcmask (!%p179_p3), 64512   ;;  %v263_v18 = vld [vmem:[%s1275_s2] sm:$0xf] (!%p179_p3)  ;;  %vm758_vm3 = vcmask (!%p179_p3), 130048  }
   0xb   : > { %959 = vmatprep.mubr.msk.bf16.mxu0 (!%p179_p3), %vm1113_vm0, %v1112_v0  ;;  %965 = vmatprep.mubr.msk.bf16.mxu1 (!%p179_p3), %vm1113_vm0, %v1112_v0  ;;  %v659_v19 = vsel (!%p179_p3), %vm273_vm1, %v263_v18, 0 }
  0x10   : > { %s1288_s13 = smov (!%p221_p5, %s1098_s13), 1  ;;  %s1290_s19 = smov (!%p223_p6, %s908_s19), 39 }
  0x11   : > { %s1027_s20 = smul.u32 40, %s1288_s13  ;;  %s911_s21 = sshll.u32 %s1290_s19, 1 }
  0x12   : > { %s1028_s22 = smul.u32 80, %s1288_s13 }
  0x13   : > { %s226_s23 = sadd.s32 %s1027_s20, %s1290_s19 }
  0x14   : > { %s909_s24 = sshll.u32 %s226_s23, 2  ;;  %s1166_s25 = sadd.s32 %s1028_s22, %s911_s21 }
  0x15   : > { %s1171_s28 = scalar_lea.vmem %s1273_s0, %s909_s24  ;;  %s912_s6 = sshll.u32 %s1166_s25, 3 }
  0x16   : > { %v253_v1 = vld [vmem:[%s1171_s28] sm:$0xf]  ;;  %v254_v2 = vld [vmem:[%s1171_s28 + $0x4] sm:$0xf]  ;;  %v255_v3 = vld [vmem:[%s1171_s28 + $0x8] sm:$0xf]  ;;  %s1224_s9 = scalar_lea.vmem %s1276_s3, %s912_s6 }
  0x17   : > { %v275_v4 = vsel %vm273_vm1, %v253_v1, 0  ;;  %v319_v5 = vsel %vm273_vm1, %v254_v2, 0  ;;  %v256_v7 = vld [vmem:[%s1171_s28 + $0xc] sm:$0xf]  ;;  %v363_v8 = vsel %vm273_vm1, %v255_v3, 0 }
  0x18   : > { %958 = vmatpush3.bf16.msra.mxu0 %v275_v4  ;;  %964 = vmatpush3.bf16.msra.mxu1 %v319_v5  ;;  %v407_v9 = vsel %vm273_vm1, %v256_v7, 0  ;;  %v257_v10 = vld [vmem:[%s1171_s28 + $0x10] sm:$0xf]  ;;  %v258_v11 = vld [vmem:[%s1171_s28 + $0x14] sm:$0xf] }
  0x19   : > { %969 = vmatprep.subr.bf16.mxu0 %v1112_v0  ;;  %975 = vmatprep.subr.bf16.mxu1 %v1112_v0  ;;  %v451_v12 = vsel %vm273_vm1, %v257_v10, 0  ;;  %v495_v13 = vsel %vm273_vm1, %v258_v11, 0  ;;  %v259_v14 = vld [vmem:[%s1171_s28 + $0x18] sm:$0xf]  ;;  %v260_v15 = vld [vmem:[%s1171_s28 + $0x1c] sm:$0xf] }
  0x1a   : > { %v539_v16 = vsel %vm273_vm1, %v259_v14, 0  ;;  %v583_v17 = vsel %vm273_vm1, %v260_v15, 0 }
  0x1b   : > { %960 = vmatmul.mubr.msk.bf16.vlgmr.msra.gmra.mrb[0].mxu0 %vm269_vm2, %v1071_v6  ;;  %966 = vmatmul.mubr.msk.bf16.vlgmr.msra.gmra.mrb[0].mxu1 %vm269_vm2, %v1071_v6 }
  0x1c   : > { %970 = vmatpush3.bf16.msra.mxu0 %v363_v8  ;;  %976 = vmatpush3.bf16.msra.mxu1 %v407_v9 }
  0x1d   : > { %971 = vmatprep.mubr.msk.bf16.mxu0 %vm1113_vm0, %v1112_v0  ;;  %977 = vmatprep.mubr.msk.bf16.mxu1 %vm1113_vm0, %v1112_v0 }
  0x1e   : > { %981 = vmatprep.subr.bf16.mxu0 %v1112_v0  ;;  %987 = vmatprep.subr.bf16.mxu1 %v1112_v0 }
  0x23   : > { %972 = vmatmul.mubr.msk.bf16.vlgmr.msra.gmra.mrb[4].mxu0 %vm269_vm2, %v1071_v6  ;;  %978 = vmatmul.mubr.msk.bf16.vlgmr.msra.gmra.mrb[4].mxu1 %vm269_vm2, %v1071_v6 }
  0x24   : > { %982 = vmatpush3.bf16.msra.mxu0 %v451_v12  ;;  %988 = vmatpush3.bf16.msra.mxu1 %v495_v13 }
  0x25   : > { %983 = vmatprep.mubr.msk.bf16.mxu0 %vm1113_vm0, %v1112_v0  ;;  %989 = vmatprep.mubr.msk.bf16.mxu1 %vm1113_vm0, %v1112_v0 }
  0x26   : > { %993 = vmatprep.subr.bf16.mxu0 %v1112_v0  ;;  %999 = vmatprep.subr.bf16.mxu1 %v1112_v0 }
  0x2b   : > { %984 = vmatmul.mubr.msk.bf16.vlgmr.msra.gmra.mrb[8].mxu0 %vm269_vm2, %v1071_v6  ;;  %990 = vmatmul.mubr.msk.bf16.vlgmr.msra.gmra.mrb[8].mxu1 %vm269_vm2, %v1071_v6 }
  0x2c   : > { %994 = vmatpush3.bf16.msra.mxu0 %v539_v16  ;;  %1000 = vmatpush3.bf16.msra.mxu1 %v583_v17 }
  0x2d   : > { %995 = vmatprep.mubr.msk.bf16.mxu0 %vm1113_vm0, %v1112_v0  ;;  %1001 = vmatprep.mubr.msk.bf16.mxu1 %vm1113_vm0, %v1112_v0 }
  0x2e   : > { %1025 = vmatprep.subr.msk.bf16.mxu0 %vm273_vm1, %v263_v18  ;;  %1026 = vmatprep.subr.msk.bf16.mxu1 %vm273_vm1, %v263_v18 }
  0x33   : > { %996 = vmatmul.mubr.msk.bf16.vlgmr.msra.gmra.mrb[12].mxu0 %vm269_vm2, %v1071_v6  ;;  %1002 = vmatmul.mubr.msk.bf16.vlgmr.msra.gmra.mrb[12].mxu1 %vm269_vm2, %v1071_v6 }
  0x34   : > { %1006 = vmatpush3.bf16.msra.mxu0 %v659_v19  ;;  %1024 = vmatpush3.bf16.msra.mxu1 %v659_v19 }
  0xee   : > { %v311_v20 = vpop.f32.mrb[0].mxu0  ;;  %v355_v21 = vpop.f32.mrb[0].mxu1 }
  0xef   : > { %v961_v22 = vpop.f32.mrb[1].mxu0  ;;  %v967_v23 = vpop.f32.mrb[1].mxu1 }
  0xf0   : > { %v314_v24 = vpop.f32.mrb[2].mxu0  ;;  %v358_v25 = vpop.f32.mrb[2].mxu1 }
  0xf1   : > { %v626_v26 = vpack.c.bf16 %v314_v24, %v311_v20  ;;  %v627_v27 = vpack.c.bf16 %v358_v25, %v355_v21  ;;  %v962_v28 = vpop.f32.mrb[3].mxu0  ;;  %v968_v29 = vpop.f32.mrb[3].mxu1 }
  0xf3   : > { %1007 = vmatprep.mubr.msk.bf16.mxu0 %vm269_vm2, %v626_v26 }
  0xf4   : > { %1008 = vmatmul.mubr.msk.bf16.vlgmr.msra.gmra.mrb[16].mxu0 %vm269_vm2, %v627_v27 }
  0xf6   : > { %v399_v30 = vpop.f32.mrb[4].mxu0  ;;  %v443_v31 = vpop.f32.mrb[4].mxu1 }
  0xf7   : > { %v973_v32 = vpop.f32.mrb[5].mxu0  ;;  %v979_v33 = vpop.f32.mrb[5].mxu1 }
  0xf8   : > { %v402_v34 = vpop.f32.mrb[6].mxu0  ;;  %v446_v35 = vpop.f32.mrb[6].mxu1 }
  0xf9   : > { %v628_v36 = vpack.c.bf16 %v402_v34, %v399_v30  ;;  %v629_v37 = vpack.c.bf16 %v446_v35, %v443_v31  ;;  %v974_v38 = vpop.f32.mrb[7].mxu0  ;;  %v980_v39 = vpop.f32.mrb[7].mxu1 }
  0xfb   : > { %1011 = vmatprep.mubr.msk.bf16.mxu0 %vm269_vm2, %v628_v36 }
  0xfc   : > { %1012 = vmatmul.mubr.msk.bf16.gmra.mrb[20].mxu0 %vm269_vm2, %v629_v37 }
  0xfe   : > { %v487_v40 = vpop.f32.mrb[8].mxu0  ;;  %v531_v41 = vpop.f32.mrb[8].mxu1 }
  0xff   : > { %v985_v42 = vpop.f32.mrb[9].mxu0  ;;  %v991_v43 = vpop.f32.mrb[9].mxu1 }
 0x100   : > { %v490_v44 = vpop.f32.mrb[10].mxu0  ;;  %v534_v45 = vpop.f32.mrb[10].mxu1 }
 0x101   : > { %v630_v46 = vpack.c.bf16 %v490_v44, %v487_v40  ;;  %v631_v47 = vpack.c.bf16 %v534_v45, %v531_v41  ;;  %v986_v48 = vpop.f32.mrb[11].mxu0  ;;  %v992_v49 = vpop.f32.mrb[11].mxu1 }
 0x103   : > { %1015 = vmatprep.mubr.msk.bf16.mxu1 %vm269_vm2, %v630_v46 }
 0x104   : > { %1016 = vmatmul.mubr.msk.bf16.vlgmr.msra.gmra.mrb[16].mxu1 %vm269_vm2, %v631_v47 }
 0x106   : > { %v575_v50 = vpop.f32.mrb[12].mxu0  ;;  %v619_v51 = vpop.f32.mrb[12].mxu1 }
 0x107   : > { %v997_v52 = vpop.f32.mrb[13].mxu0  ;;  %v1003_v53 = vpop.f32.mrb[13].mxu1 }
 0x108   : > { %v578_v54 = vpop.f32.mrb[14].mxu0  ;;  %v622_v55 = vpop.f32.mrb[14].mxu1 }
 0x109   : > { %v632_v56 = vpack.c.bf16 %v578_v54, %v575_v50  ;;  %v633_v57 = vpack.c.bf16 %v622_v55, %v619_v51  ;;  %v998_v58 = vpop.f32.mrb[15].mxu0  ;;  %v1004_v59 = vpop.f32.mrb[15].mxu1 }
 0x10b   : > { %1019 = vmatprep.mubr.msk.bf16.mxu1 %vm269_vm2, %v632_v56 }
 0x10c   : > { %1020 = vmatmul.mubr.msk.bf16.gmra.mrb[20].mxu1 %vm269_vm2, %v633_v57 }
 0x1c7   : > { %v1009_v60 = vpop.f32.mrb[16].mxu0 }
 0x1c8   : > { %761 = vst.msk [vmem:[%s1224_s9 + $0x10] sm:$0xff] %vm758_vm3, %v1009_v60  ;;  %v695_v61 = vpop.f32.mrb[17].mxu0 }
 0x1c9   : > { %759 = vst.msk [vmem:[%s1224_s9] sm:$0xff] %vm758_vm3, %v695_v61  ;;  %v1010_v62 = vpop.f32.mrb[18].mxu0 }
 0x1ca   : > { %762 = vst.msk [vmem:[%s1224_s9 + $0x18] sm:$0xff] %vm758_vm3, %v1010_v62  ;;  %v698_v63 = vpop.f32.mrb[19].mxu0 }
 0x1cb   : > { %760 = vst.msk [vmem:[%s1224_s9 + $0x8] sm:$0xff] %vm758_vm3, %v698_v63 }
 0x1cf   : > { %v1013_v0 = vpop.f32.mrb[20].mxu0 }
 0x1d0   : > { %765 = vst.msk [vmem:[%s1224_s9 + $0x30] sm:$0xff] %vm758_vm3, %v1013_v0  ;;  %v711_v1 = vpop.f32.mrb[21].mxu0 }
 0x1d1   : > { %763 = vst.msk [vmem:[%s1224_s9 + $0x20] sm:$0xff] %vm758_vm3, %v711_v1  ;;  %v1014_v2 = vpop.f32.mrb[22].mxu0 }
 0x1d2   : > { %766 = vst.msk [vmem:[%s1224_s9 + $0x38] sm:$0xff] %vm758_vm3, %v1014_v2  ;;  %v714_v3 = vpop.f32.mrb[23].mxu0 }
 0x1d3   : > { %764 = vst.msk [vmem:[%s1224_s9 + $0x28] sm:$0xff] %vm758_vm3, %v714_v3 }
 0x1d7   : > { %v1017_v4 = vpop.f32.mrb[16].mxu1 }
 0x1d8   : > { %769 = vst.msk [vmem:[%s1224_s9 + $0x50] sm:$0xff] %vm758_vm3, %v1017_v4  ;;  %v727_v5 = vpop.f32.mrb[17].mxu1 }
 0x1d9   : > { %767 = vst.msk [vmem:[%s1224_s9 + $0x40] sm:$0xff] %vm758_vm3, %v727_v5  ;;  %v1018_v6 = vpop.f32.mrb[18].mxu1 }
 0x1da   : > { %770 = vst.msk [vmem:[%s1224_s9 + $0x58] sm:$0xff] %vm758_vm3, %v1018_v6  ;;  %v730_v7 = vpop.f32.mrb[19].mxu1 }
 0x1db   : > { %768 = vst.msk [vmem:[%s1224_s9 + $0x48] sm:$0xff] %vm758_vm3, %v730_v7 }
 0x1df   : > { %v1021_v8 = vpop.f32.mrb[20].mxu1 }
 0x1e0   : > { %773 = vst.msk [vmem:[%s1224_s9 + $0x70] sm:$0xff] %vm758_vm3, %v1021_v8  ;;  %v743_v9 = vpop.f32.mrb[21].mxu1 }
 0x1e1   : > { %771 = vst.msk [vmem:[%s1224_s9 + $0x60] sm:$0xff] %vm758_vm3, %v743_v9  ;;  %v1022_v10 = vpop.f32.mrb[22].mxu1 }
 0x1e2   : > { %774 = vst.msk [vmem:[%s1224_s9 + $0x78] sm:$0xff] %vm758_vm3, %v1022_v10  ;;  %v746_v11 = vpop.f32.mrb[23].mxu1 }
 0x1e3   : > { %772 = vst.msk [vmem:[%s1224_s9 + $0x68] sm:$0xff] %vm758_vm3, %v746_v11 }
 0x1e4 PF: > { %s13_s16 = sadd.s32 1, %s1110_s16   ;;  %s1277_s12 = smov %s1102_s14 }
 0x1e5   : > { %p10_p7 = scmp.ge.s32.totalorder %s13_s16, 12   ;;  %s1278_s13 = smov %s1106_s15 }
 0x1e6   : > { %s1279_s14 = smov %s1282_s17  ;;  %s1280_s15 = smov %s1286_s18 }
 0x1e7   :  { %12 = sbr.rel (!%p10_p7) target bundleno = 3 (0x3), region = 65 }

</bundles_post_ra>
